<compile_context>
chip_gen: v6e
topology: v6e:2x2x1
jax: 0.10.0
libtpu: 0.0.40
codegen_flags: <defaults>
</compile_context>

<pallas_src>
import jax
import jax.numpy as jnp
from jax.experimental import pallas as pl
from jax.experimental.pallas import tpu as pltpu

_PACK = 8  # batch rows packed into the lane dimension


def _round_up(x: int, m: int) -> int:
    return (x + m - 1) // m * m


def _q_mlp_kernel(obs_ref, act_ref, w1o_ref, w1a_ref, b1_ref,
                  w2_ref, b2_ref, w3_ref, b3_ref, o_ref):
    # Layer 1 (concat fused): concat([obs, act]) @ W1 == obs@W1_obs + act@W1_act.
    # Matmul operands in bf16, accumulation in f32; bias-add / ReLU kept in f32.
    obs = obs_ref[...].astype(jnp.bfloat16)
    act = act_ref[...].astype(jnp.bfloat16)
    h = jnp.dot(obs, w1o_ref[...], preferred_element_type=jnp.float32)
    h += jnp.dot(act, w1a_ref[...], preferred_element_type=jnp.float32)
    h = jnp.maximum(h + b1_ref[...], 0.0)
    # Layer 2: Linear + ReLU.
    h = jnp.dot(h.astype(jnp.bfloat16), w2_ref[...],
                preferred_element_type=jnp.float32)
    h = jnp.maximum(h + b2_ref[...], 0.0)
    # Output layer: block-diagonal packed W3' -> lane-packed (rows, 8) q tile.
    q = jnp.dot(h.astype(jnp.bfloat16), w3_ref[...],
                preferred_element_type=jnp.float32)
    o_ref[...] = q + b3_ref[0, 0]


def pack_params(params, obs_dim, act_dim):
    """Build lane-packed block-diagonal weights once (outside the hot path)."""
    w1, b1, w2, b2, w3, b3 = params
    P = _PACK

    def bd(w):  # block_diag([w]*P) cast once to a bf16 MXU operand
        return jax.scipy.linalg.block_diag(*([w] * P)).astype(jnp.bfloat16)

    w1o_p = bd(w1[:obs_dim, :])                                     # (P*obs_dim, P*h1)
    w1a_p = bd(w1[obs_dim:, :])                                     # (P*act_dim, P*h1)
    w2_p = bd(w2)                                                   # (P*h1, P*h2)
    w3_p = bd(w3)                                                   # (P*h2, P)
    b1_p = jnp.tile(jnp.reshape(b1, (1, -1)), (1, P)).astype(jnp.float32)
    b2_p = jnp.tile(jnp.reshape(b2, (1, -1)), (1, P)).astype(jnp.float32)
    b3_p = jnp.reshape(b3, (1, 1)).astype(jnp.float32)              # SMEM scalar
    return (w1o_p, w1a_p, b1_p, w2_p, b2_p, w3_p, b3_p)


def mlp_q_function(obs, act, packed_params, *, block_b=4096):
    """Pallas-backed forward: MLP(concat(obs, act)) -> squeeze(-1), shape (B,)."""
    w1o_p, w1a_p, b1_p, w2_p, b2_p, w3_p, b3_p = packed_params
    P = _PACK
    obs = obs.astype(jnp.float32)
    act = act.astype(jnp.float32)

    B, obs_dim = obs.shape
    act_dim = act.shape[1]
    h1 = w2_p.shape[0] // P
    h2 = w2_p.shape[1] // P

    # Lane-packing needs a row count divisible by 8.  Only this tiny (<8 rows)
    # pad can ever materialize; the grid never pads to a tile multiple because
    # the boundary tile is masked by Pallas (safe: no cross-row coupling).
    Bp = _round_up(B, P)
    if Bp != B:
        pad = Bp - B
        obs = jnp.pad(obs, ((0, pad), (0, 0)))
        act = jnp.pad(act, ((0, pad), (0, 0)))
    R = Bp // P                               # packed rows
    obs_p = obs.reshape(R, P * obs_dim)       # free contiguous reshape
    act_p = act.reshape(R, P * act_dim)

    # Packed-row tile: amortize per-step overhead, but keep >=2 grid steps when
    # possible so v7x megacore splits the batch across both TensorCores.
    tb = _round_up(max(int(block_b) // P, 1), 8)
    if R > 8:
        tb = min(tb, _round_up(-(-R // 2), 8))
    else:
        tb = R                                # single full-extent tile
    grid = (pl.cdiv(R, tb),)

    def resident(a):  # full array, constant block index -> stays VMEM-resident
        return pl.BlockSpec(a.shape, lambda i: (0, 0))

    param_bytes = (2 * (w1o_p.size + w1a_p.size + w2_p.size + w3_p.size)
                   + 4 * (b1_p.size + b2_p.size + b3_p.size))
    cost = pl.CostEstimate(
        flops=2 * Bp * ((obs_dim + act_dim) * h1 + h1 * h2 + h2),
        transcendentals=0,
        bytes_accessed=Bp * (obs_dim + act_dim + 1) * 4 + param_bytes,
    )

    out = pl.pallas_call(
        _q_mlp_kernel,
        out_shape=jax.ShapeDtypeStruct((R, P), jnp.float32),
        grid=grid,
        in_specs=[
            pl.BlockSpec((tb, P * obs_dim), lambda i: (i, 0)),   # streamed per tile
            pl.BlockSpec((tb, P * act_dim), lambda i: (i, 0)),   # streamed per tile
            resident(w1o_p),
            resident(w1a_p),
            resident(b1_p),
            resident(w2_p),
            resident(b2_p),
            resident(w3_p),
            pl.BlockSpec(memory_space=pltpu.MemorySpace.SMEM),   # scalar bias b3
        ],
        out_specs=pl.BlockSpec((tb, P), lambda i: (i, 0)),
        compiler_params=pltpu.CompilerParams(
            dimension_semantics=("parallel",),   # megacore batch split on v7x
        ),
        cost_estimate=cost,
    )(obs_p, act_p, w1o_p, w1a_p, b1_p, w2_p, b2_p, w3_p, b3_p)

    return out.reshape(Bp)[:B]   # (B,)


def init_params(key, obs_dim, act_dim, hidden_sizes):
    """Deterministic synthetic init (PyTorch-Linear-like uniform fan-in bound)."""
    dims = [obs_dim + act_dim] + list(hidden_sizes) + [1]
    params = []
    for i in range(len(dims) - 1):
        fan_in, fan_out = dims[i], dims[i + 1]
        key, kw, kb = jax.random.split(key, 3)
        bound = 1.0 / jnp.sqrt(jnp.float32(fan_in))
        w = jax.random.uniform(kw, (fan_in, fan_out), jnp.float32, -bound, bound)
        b = jax.random.uniform(kb, (1, fan_out), jnp.float32, -bound, bound)
        params += [w, b]
    return tuple(params)


def _reference(obs, act, params):
    w1, b1, w2, b2, w3, b3 = params
    x = jnp.concatenate([obs, act], axis=-1)
    h = jnp.maximum(x @ w1 + b1, 0.0)
    h = jnp.maximum(h @ w2 + b2, 0.0)
    return jnp.squeeze(h @ w3 + b3, axis=-1)


if __name__ == "__main__":
    obs_dim, act_dim = 16, 8
    hidden_sizes = (32, 32)

    key = jax.random.PRNGKey(0)
    k_obs, k_act, k_par, k_obs2, k_act2 = jax.random.split(key, 5)
    params = init_params(k_par, obs_dim, act_dim, hidden_sizes)
    packed = pack_params(params, obs_dim, act_dim)

    # Case 1: tiny batch, single full-extent tile.
    batch = 8
    obs = jax.random.normal(k_obs, (batch, obs_dim), jnp.float32)
    act = jax.random.normal(k_act, (batch, act_dim), jnp.float32)
    q = mlp_q_function(obs, act, packed)
    jax.block_until_ready(q)
    q_ref = _reference(obs, act, params)
    assert q.shape == (batch,)
    assert jnp.allclose(q, q_ref, atol=5e-2, rtol=5e-2), \
        float(jnp.max(jnp.abs(q - q_ref)))

    # Case 2: multiple grid steps + masked boundary tile + ragged B (B % 8 != 0).
    batch2 = 300
    obs2 = jax.random.normal(k_obs2, (batch2, obs_dim), jnp.float32)
    act2 = jax.random.normal(k_act2, (batch2, act_dim), jnp.float32)
    q2 = mlp_q_function(obs2, act2, packed, block_b=128)
    jax.block_until_ready(q2)
    q2_ref = _reference(obs2, act2, params)
    assert q2.shape == (batch2,)
    assert jnp.allclose(q2, q2_ref, atol=5e-2, rtol=5e-2), \
        float(jnp.max(jnp.abs(q2 - q2_ref)))

    print("KERNEL_OK")
</pallas_src>

<mosaic_0001>
module attributes {stable_mosaic.version = 11 : i64} {
  func.func @_q_mlp_kernel(%arg0: i32, %arg1: memref<1x128xf32, #tpu.memory_space<vmem>>, %arg2: memref<1x64xf32, #tpu.memory_space<vmem>>, %arg3: memref<128x256xbf16, #tpu.memory_space<vmem>>, %arg4: memref<64x256xbf16, #tpu.memory_space<vmem>>, %arg5: memref<1x256xf32, #tpu.memory_space<vmem>>, %arg6: memref<256x256xbf16, #tpu.memory_space<vmem>>, %arg7: memref<1x256xf32, #tpu.memory_space<vmem>>, %arg8: memref<256x8xbf16, #tpu.memory_space<vmem>>, %arg9: memref<1x1xf32, #tpu.memory_space<smem>>, %arg10: memref<1x8xf32, #tpu.memory_space<vmem>>) attributes {dimension_semantics = [#tpu.dimension_semantics<parallel>], iteration_bounds = array<i64: 1>, scalar_prefetch = 0 : i64, scratch_operands = 0 : i64, tpu.core_type = #tpu.core_type<tc>, window_params = [{transform_indices = @transform_0, window_bounds = array<i64: 1, 128>}, {transform_indices = @transform_1, window_bounds = array<i64: 1, 64>}, {pipeline_mode = #tpu.pipeline_mode<synchronous>, transform_indices = @transform_2, window_bounds = array<i64: 128, 256>}, {pipeline_mode = #tpu.pipeline_mode<synchronous>, transform_indices = @transform_3, window_bounds = array<i64: 64, 256>}, {pipeline_mode = #tpu.pipeline_mode<synchronous>, transform_indices = @transform_4, window_bounds = array<i64: 1, 256>}, {pipeline_mode = #tpu.pipeline_mode<synchronous>, transform_indices = @transform_5, window_bounds = array<i64: 256, 256>}, {pipeline_mode = #tpu.pipeline_mode<synchronous>, transform_indices = @transform_6, window_bounds = array<i64: 1, 256>}, {pipeline_mode = #tpu.pipeline_mode<synchronous>, transform_indices = @transform_7, window_bounds = array<i64: 256, 8>}, {transform_indices = @transform_8, window_bounds = array<i64: 1, 1>}, {transform_indices = @transform_9, window_bounds = array<i64: 1, 8>}]} {
    %c0 = arith.constant 0 : index
    %c0_0 = arith.constant 0 : index
    %0 = vector.load %arg1[%c0, %c0_0] : memref<1x128xf32, #tpu.memory_space<vmem>>, vector<1x128xf32>
    %1 = arith.truncf %0 : vector<1x128xf32> to vector<1x128xbf16>
    %c0_1 = arith.constant 0 : index
    %c0_2 = arith.constant 0 : index
    %2 = vector.load %arg2[%c0_1, %c0_2] : memref<1x64xf32, #tpu.memory_space<vmem>>, vector<1x64xf32>
    %3 = arith.truncf %2 : vector<1x64xf32> to vector<1x64xbf16>
    %c0_3 = arith.constant 0 : index
    %c0_4 = arith.constant 0 : index
    %4 = vector.load %arg3[%c0_3, %c0_4] : memref<128x256xbf16, #tpu.memory_space<vmem>>, vector<128x256xbf16>
    %cst = arith.constant dense<0.000000e+00> : vector<1x256xf32>
    %5 = tpu.matmul %1, %4, %cst {dimension_numbers = #tpu.dot_dimension_numbers<[1], [0], [0], [1], [0, 0, 1, 1], [], []>} : vector<1x128xbf16>, vector<128x256xbf16>, vector<1x256xf32> -> vector<1x256xf32>
    %c0_5 = arith.constant 0 : index
    %c0_6 = arith.constant 0 : index
    %6 = vector.load %arg4[%c0_5, %c0_6] : memref<64x256xbf16, #tpu.memory_space<vmem>>, vector<64x256xbf16>
    %cst_7 = arith.constant dense<0.000000e+00> : vector<1x256xf32>
    %7 = tpu.matmul %3, %6, %cst_7 {dimension_numbers = #tpu.dot_dimension_numbers<[1], [0], [0], [1], [0, 0, 1, 1], [], []>} : vector<1x64xbf16>, vector<64x256xbf16>, vector<1x256xf32> -> vector<1x256xf32>
    %8 = arith.addf %5, %7 : vector<1x256xf32>
    %c0_8 = arith.constant 0 : index
    %c0_9 = arith.constant 0 : index
    %9 = vector.load %arg5[%c0_8, %c0_9] : memref<1x256xf32, #tpu.memory_space<vmem>>, vector<1x256xf32>
    %10 = arith.addf %8, %9 : vector<1x256xf32>
    %cst_10 = arith.constant 0.000000e+00 : f32
    %11 = vector.broadcast %cst_10 : f32 to vector<1x256xf32>
    %12 = arith.maximumf %10, %11 : vector<1x256xf32>
    %13 = arith.truncf %12 : vector<1x256xf32> to vector<1x256xbf16>
    %c0_11 = arith.constant 0 : index
    %c0_12 = arith.constant 0 : index
    %14 = vector.load %arg6[%c0_11, %c0_12] : memref<256x256xbf16, #tpu.memory_space<vmem>>, vector<256x256xbf16>
    %cst_13 = arith.constant dense<0.000000e+00> : vector<1x256xf32>
    %15 = tpu.matmul %13, %14, %cst_13 {dimension_numbers = #tpu.dot_dimension_numbers<[1], [0], [0], [1], [0, 0, 1, 1], [], []>} : vector<1x256xbf16>, vector<256x256xbf16>, vector<1x256xf32> -> vector<1x256xf32>
    %c0_14 = arith.constant 0 : index
    %c0_15 = arith.constant 0 : index
    %16 = vector.load %arg7[%c0_14, %c0_15] : memref<1x256xf32, #tpu.memory_space<vmem>>, vector<1x256xf32>
    %17 = arith.addf %15, %16 : vector<1x256xf32>
    %cst_16 = arith.constant 0.000000e+00 : f32
    %18 = vector.broadcast %cst_16 : f32 to vector<1x256xf32>
    %19 = arith.maximumf %17, %18 : vector<1x256xf32>
    %20 = arith.truncf %19 : vector<1x256xf32> to vector<1x256xbf16>
    %c0_17 = arith.constant 0 : index
    %c0_18 = arith.constant 0 : index
    %21 = vector.load %arg8[%c0_17, %c0_18] : memref<256x8xbf16, #tpu.memory_space<vmem>>, vector<256x8xbf16>
    %cst_19 = arith.constant dense<0.000000e+00> : vector<1x8xf32>
    %22 = tpu.matmul %20, %21, %cst_19 {dimension_numbers = #tpu.dot_dimension_numbers<[1], [0], [0], [1], [0, 0, 1, 1], [], []>} : vector<1x256xbf16>, vector<256x8xbf16>, vector<1x8xf32> -> vector<1x8xf32>
    %c0_20 = arith.constant 0 : index
    %c0_21 = arith.constant 0 : index
    %23 = memref.load %arg9[%c0_20, %c0_21] : memref<1x1xf32, #tpu.memory_space<smem>>
    %24 = vector.broadcast %23 : f32 to vector<1x8xf32>
    %25 = arith.addf %22, %24 : vector<1x8xf32>
    %c0_22 = arith.constant 0 : index
    %c0_23 = arith.constant 0 : index
    %26 = vector.load %arg10[%c0_22, %c0_23] : memref<1x8xf32, #tpu.memory_space<vmem>>, vector<1x8xf32>
    tpu.vector_store %arg10[%c0_22, %c0_23], %25 {strides = array<i32>} : memref<1x8xf32, #tpu.memory_space<vmem>>, vector<1x8xf32>,
    return
  }
  func.func @transform_0(%arg0: i32) -> (i32, i32) {
    %c0_i32 = arith.constant 0 : i32
    %c0_i32_0 = arith.constant 0 : i32
    return %arg0, %c0_i32 : i32, i32
  }
  func.func @transform_1(%arg0: i32) -> (i32, i32) {
    %c0_i32 = arith.constant 0 : i32
    %c0_i32_0 = arith.constant 0 : i32
    return %arg0, %c0_i32 : i32, i32
  }
  func.func @transform_2(%arg0: i32) -> (i32, i32) {
    %c0_i32 = arith.constant 0 : i32
    %c0_i32_0 = arith.constant 0 : i32
    %c0_i32_1 = arith.constant 0 : i32
    return %c0_i32, %c0_i32_0 : i32, i32
  }
  func.func @transform_3(%arg0: i32) -> (i32, i32) {
    %c0_i32 = arith.constant 0 : i32
    %c0_i32_0 = arith.constant 0 : i32
    %c0_i32_1 = arith.constant 0 : i32
    return %c0_i32, %c0_i32_0 : i32, i32
  }
  func.func @transform_4(%arg0: i32) -> (i32, i32) {
    %c0_i32 = arith.constant 0 : i32
    %c0_i32_0 = arith.constant 0 : i32
    %c0_i32_1 = arith.constant 0 : i32
    return %c0_i32, %c0_i32_0 : i32, i32
  }
  func.func @transform_5(%arg0: i32) -> (i32, i32) {
    %c0_i32 = arith.constant 0 : i32
    %c0_i32_0 = arith.constant 0 : i32
    %c0_i32_1 = arith.constant 0 : i32
    return %c0_i32, %c0_i32_0 : i32, i32
  }
  func.func @transform_6(%arg0: i32) -> (i32, i32) {
    %c0_i32 = arith.constant 0 : i32
    %c0_i32_0 = arith.constant 0 : i32
    %c0_i32_1 = arith.constant 0 : i32
    return %c0_i32, %c0_i32_0 : i32, i32
  }
  func.func @transform_7(%arg0: i32) -> (i32, i32) {
    %c0_i32 = arith.constant 0 : i32
    %c0_i32_0 = arith.constant 0 : i32
    %c0_i32_1 = arith.constant 0 : i32
    return %c0_i32, %c0_i32_0 : i32, i32
  }
  func.func @transform_8(%arg0: i32) -> (i32, i32) {
    %c0_i32 = arith.constant 0 : i32
    %c0_i32_0 = arith.constant 0 : i32
    %c0_i32_1 = arith.constant 0 : i32
    return %c0_i32, %c0_i32_0 : i32, i32
  }
  func.func @transform_9(%arg0: i32) -> (i32, i32) {
    %c0_i32 = arith.constant 0 : i32
    %c0_i32_0 = arith.constant 0 : i32
    return %arg0, %c0_i32 : i32, i32
  }
}

</mosaic_0001>

<bundles_post_ra>
// kernel: tpu_custom_call.1
= control target key start
LH: loop header
LB: loop body
LE: loop exit
PB: predicated region body
PF: predicated region fallthrough
CT: control target
= control target key end

     0   :  { %15 = vsyncpa [#allocation4], 0  ;;  %s1195_s0 = inlined_call_operand.vmem [shape: f32[1,128], index: 0, kind: input, shape index: {}]   ;;  %s1196_s1 = inlined_call_operand.vmem [shape: f32[1,64], index: 1, kind: input, shape index: {}]   ;;  %s1197_s2 = inlined_call_operand.vmem [shape: bf16[128,256], index: 2, kind: input, shape index: {}]   ;;  %s1198_s3 = inlined_call_operand.hbm [shape: bf16[64,256], index: 3, kind: input, shape index: {}]   ;;  %s1199_s4 = inlined_call_operand.vmem [shape: f32[1,256], index: 4, kind: input, shape index: {}]   ;;  %s1200_s5 = inlined_call_operand.hbm [shape: bf16[256,256], index: 5, kind: input, shape index: {}]   ;;  %s1201_s6 = inlined_call_operand.vmem [shape: f32[1,256], index: 6, kind: input, shape index: {}]   ;;  %s1202_s7 = inlined_call_operand.vmem [shape: bf16[256,8], index: 7, kind: input, shape index: {}]   ;;  %s1203_s8 = inlined_call_operand.<no memory space> [shape: f32[1,1], index: 8, kind: input, shape index: {}]   ;;  %s1204_s9 = inlined_call_operand.hbm [shape: f32[1,8], index: 9, kind: output, shape index: {}]  }
   0x1   :  { %16 = vsyncpa [#allocation7], 0 }
   0x2   :  { %17 = vsyncpa [#allocation5], 0  ;;  %s1019_s30 = smov [#allocation3]  }
   0x3   :  { %s29_s10 = sshll.u32 %s1019_s30, 4  ;;  %s30_s10 = int_to_ptr.vmem [resolvable:$true] %s29_s10 }
   0x4   :  { %s961_s11 = scalar_lea.vmem %s30_s10, 1024  ;;  %p966_p1 = scmp.lt.s32.totalorder %s30_s10, %s30_s10 }
   0x5   :  { %p962_p0 = scmp.ne.s32.totalorder %s30_s10, %s961_s11  ;;  %p967_p2 = scmp.lt.s32.totalorder %s961_s11, %s961_s11 }
   0x7   :  { %p968_p3 = por %p967_p2, %p966_p1 }
   0x9   :  { %p969_p4 = pnand %p968_p3, %p962_p0 }
   0xb   :  { %972 = shalt.err (!%p969_p4)
}
   0xc   :  { %s1020_s12 = smov 128   ;;  %s1021_s13 = smov 8  }
   0xd   :  { %35 = dma.hbm_to_vmem [thread:$0]  %s1198_s3, 1024, %s30_s10, [#allocation4], %s1020_s12, %s1020_s12, %s1021_s13  }
   0xe   :  { %s1022_s16 = smov [#allocation6]  }
   0xf   :  { %s43_s17 = sshll.u32 %s1022_s16, 4  ;;  %s44_s17 = int_to_ptr.vmem [resolvable:$true] %s43_s17 }
  0x10   :  { %s981_s18 = scalar_lea.vmem %s44_s17, 4096  ;;  %p986_p6 = scmp.lt.s32.totalorder %s44_s17, %s44_s17 }
  0x11   :  { %p982_p5 = scmp.ne.s32.totalorder %s44_s17, %s981_s18  ;;  %p987_p7 = scmp.lt.s32.totalorder %s981_s18, %s981_s18 }
  0x13   :  { %p988_p8 = por %p987_p7, %p986_p6 }
  0x15   :  { %p989_p9 = pnand %p988_p8, %p982_p5 }
  0x17   :  { %992 = shalt.err (!%p989_p9)
}
  0x18   :  { %49 = dma.hbm_to_vmem [thread:$0]  %s1200_s5, 4096, %s44_s17, [#allocation7], %s1020_s12, %s1020_s12, %s1021_s13  }
  0x19   :  { %1013 = dma.done.wait [#allocation4], 1024  }
  0x1a   :  { %1014 = vsyncadd [#allocation4], 4294966272 }
  0x1b   :  { %1015 = dma.done.wait [#allocation7], 4096  }
  0x1c   :  { %1016 = vsyncadd [#allocation7], 4294963200  ;;  %v1023_v0 = vmov 0   ;;  %v853_v1 = vld [vmem:[%s1197_s2 + $0x74] ss:$8 sps:$4 sm:$0xff]   ;;  %vm131_vm0 = vcmask 523264  }
  0x1d   :  { %167 = vmatprep.mubr.bf16.mxu0 %v1023_v0  ;;  %288 = vmatprep.mubr.bf16.mxu1 %v1023_v0  ;;  %v855_v2 = vld [vmem:[%s1197_s2 + $0x70] ss:$8 sps:$4 sm:$0xff]   ;;  %v856_v3 = vld [vmem:[%s1197_s2 + $0x64] ss:$8 sps:$4 sm:$0xff]   ;;  %v858_v4 = vld [vmem:[%s1197_s2 + $0x60] ss:$8 sps:$4 sm:$0xff]  }
  0x1e   :  { %256 = vmatprep.subr.bf16.mxu1 %v853_v1  ;;  %v859_v5 = vld [vmem:[%s1197_s2 + $0x54] ss:$8 sps:$4 sm:$0xff]   ;;  %v864_v7 = vld [vmem:[#allocation3 + $0x30] ss:$8 sps:$4 sm:$0xff]   ;;  %v868_v9 = vld [vmem:[#allocation3 + $0x24] ss:$8 sps:$4 sm:$0xff]  }
  0x1f   :  { %257 = vmatpush1.bf16.msra.mxu1 %v855_v2  ;;  %v862_v6 = vld [vmem:[#allocation3 + $0x34] ss:$8 sps:$4 sm:$0xff]   ;;  %v861_v8 = vld [vmem:[%s1197_s2 + $0x50] ss:$8 sps:$4 sm:$0xff]   ;;  %v870_v10 = vld [vmem:[#allocation3 + $0x20] ss:$8 sps:$4 sm:$0xff]  }
  0x20   :  { %258 = vmatprep.subr.bf16.mxu1 %v856_v3  ;;  %143 = vmatprep.subr.bf16.mxu0 %v862_v6  ;;  %v865_v11 = vld [vmem:[%s1197_s2 + $0x44] ss:$8 sps:$4 sm:$0xff]   ;;  %v867_v12 = vld [vmem:[%s1197_s2 + $0x40] ss:$8 sps:$4 sm:$0xff]   ;;  %v874_v13 = vld [vmem:[#allocation3 + $0x14] ss:$8 sps:$4 sm:$0xff]  }
  0x21   :  { %144 = vmatpush1.bf16.msra.mxu0 %v864_v7  ;;  %v871_v14 = vld [vmem:[%s1197_s2 + $0x34] ss:$8 sps:$4 sm:$0xff]   ;;  %v876_v15 = vld [vmem:[#allocation3 + $0x10] ss:$8 sps:$4 sm:$0xff]   ;;  %v880_v16 = vld [vmem:[#allocation3 + $0x4] ss:$8 sps:$4 sm:$0xff]  }
  0x22   :  { %145 = vmatprep.subr.bf16.mxu0 %v868_v9  ;;  %v873_v17 = vld [vmem:[%s1197_s2 + $0x30] ss:$8 sps:$4 sm:$0xff]   ;;  %v882_v18 = vld [vmem:[#allocation3] ss:$8 sps:$4 sm:$0xff]   ;;  %v877_v20 = vld [vmem:[%s1197_s2 + $0x24] ss:$8 sps:$4 sm:$0xff]   ;;  %v299_v9 = vlaneseq }
  0x23   :  { %259 = vmatpush1.bf16.msra.mxu1 %v858_v4  ;;  %v65_v19 = vld [vmem:[%s1196_s1] sm:$0x1]  ;;  %v891_v21 = vld [vmem:[#allocation6 + $0x74] ss:$8 sps:$4 sm:$0xff]   ;;  %v889_v24 = vld [vmem:[#allocation6 + $0x70] ss:$8 sps:$4 sm:$0xff]  }
  0x24   :  { %260 = vmatprep.subr.bf16.mxu1 %v859_v5  ;;  %v879_v22 = vld [vmem:[%s1197_s2 + $0x20] ss:$8 sps:$4 sm:$0xff]   ;;  %v66_v23 = vpack.c.bf16 %v65_v19, %v65_v19  ;;  %v883_v25 = vld [vmem:[%s1197_s2 + $0x14] ss:$8 sps:$4 sm:$0xff]   ;;  %v894_v26 = vld [vmem:[#allocation6 + $0x64] ss:$8 sps:$4 sm:$0xff]  }
  0x25   :  { %146 = vmatpush1.bf16.msra.mxu0 %v870_v10  ;;  %v885_v27 = vld [vmem:[%s1197_s2 + $0x10] ss:$8 sps:$4 sm:$0xff]   ;;  %v892_v28 = vld [vmem:[#allocation6 + $0x60] ss:$8 sps:$4 sm:$0xff]   ;;  %v886_v29 = vld [vmem:[%s1197_s2 + $0x4] ss:$8 sps:$4 sm:$0xff]  }
  0x26   :  { %147 = vmatprep.subr.bf16.mxu0 %v874_v13  ;;  %v897_v30 = vld [vmem:[#allocation6 + $0x54] ss:$8 sps:$4 sm:$0xff]   ;;  %v888_v31 = vld [vmem:[%s1197_s2] ss:$8 sps:$4 sm:$0xff]   ;;  %v895_v33 = vld [vmem:[#allocation6 + $0x50] ss:$8 sps:$4 sm:$0xff]  }
  0x27   :  { %261 = vmatpush1.bf16.msra.mxu1 %v861_v8  ;;  %v63_v32 = vld [vmem:[%s1195_s0] sm:$0x1]  ;;  %v900_v34 = vld [vmem:[#allocation6 + $0x44] ss:$8 sps:$4 sm:$0xff]   ;;  %v903_v37 = vld [vmem:[#allocation6 + $0x34] ss:$8 sps:$4 sm:$0xff]  }
  0x28   :  { %262 = vmatprep.subr.bf16.mxu1 %v865_v11  ;;  %v64_v35 = vpack.c.bf16 %v63_v32, %v63_v32  ;;  %v898_v36 = vld [vmem:[#allocation6 + $0x40] ss:$8 sps:$4 sm:$0xff]   ;;  %v901_v38 = vld [vmem:[#allocation6 + $0x30] ss:$8 sps:$4 sm:$0xff]   ;;  %v906_v39 = vld [vmem:[#allocation6 + $0x24] ss:$8 sps:$4 sm:$0xff]  }
  0x29   :  { %148 = vmatpush1.bf16.msra.mxu0 %v876_v15  ;;  %v904_v40 = vld [vmem:[#allocation6 + $0x20] ss:$8 sps:$4 sm:$0xff]   ;;  %v909_v41 = vld [vmem:[#allocation6 + $0x14] ss:$8 sps:$4 sm:$0xff]   ;;  %v907_v42 = vld [vmem:[#allocation6 + $0x10] ss:$8 sps:$4 sm:$0xff]  }
  0x2a   :  { %149 = vmatprep.subr.bf16.mxu0 %v880_v16  ;;  %v912_v43 = vld [vmem:[#allocation6 + $0x4] ss:$8 sps:$4 sm:$0xff]   ;;  %v910_v44 = vld [vmem:[#allocation6] ss:$8 sps:$4 sm:$0xff]   ;;  %v915_v45 = vld [vmem:[#allocation6 + $0xf4] ss:$8 sps:$4 sm:$0xff]  }
  0x2b   :  { %263 = vmatpush1.bf16.msra.mxu1 %v867_v12  ;;  %v913_v46 = vld [vmem:[#allocation6 + $0xf0] ss:$8 sps:$4 sm:$0xff]   ;;  %v918_v47 = vld [vmem:[#allocation6 + $0xe4] ss:$8 sps:$4 sm:$0xff]   ;;  %v916_v48 = vld [vmem:[#allocation6 + $0xe0] ss:$8 sps:$4 sm:$0xff]  }
  0x2c   :  { %264 = vmatprep.subr.bf16.mxu1 %v871_v14  ;;  %v921_v49 = vld [vmem:[#allocation6 + $0xd4] ss:$8 sps:$4 sm:$0xff]   ;;  %v919_v50 = vld [vmem:[#allocation6 + $0xd0] ss:$8 sps:$4 sm:$0xff]   ;;  %v924_v51 = vld [vmem:[#allocation6 + $0xc4] ss:$8 sps:$4 sm:$0xff]  }
  0x2d   :  { %150 = vmatpush1.bf16.msra.mxu0 %v882_v18  ;;  %v922_v52 = vld [vmem:[#allocation6 + $0xc0] ss:$8 sps:$4 sm:$0xff]   ;;  %v925_v53 = vld [vmem:[#allocation6 + $0xb0] ss:$8 sps:$4 sm:$0xff]   ;;  %v927_v54 = vld [vmem:[#allocation6 + $0xb4] ss:$8 sps:$4 sm:$0xff]  }
  0x2e   :  { %519 = vmatprep.subr.bf16.mxu0 %v891_v21  ;;  %v930_v55 = vld [vmem:[#allocation6 + $0xa4] ss:$8 sps:$4 sm:$0xff]   ;;  %v928_v56 = vld [vmem:[#allocation6 + $0xa0] ss:$8 sps:$4 sm:$0xff]   ;;  %v933_v57 = vld [vmem:[#allocation6 + $0x94] ss:$8 sps:$4 sm:$0xff]  }
  0x2f   :  { %265 = vmatpush1.bf16.msra.mxu1 %v873_v17  ;;  %v931_v58 = vld [vmem:[#allocation6 + $0x90] ss:$8 sps:$4 sm:$0xff]   ;;  %v936_v59 = vld [vmem:[#allocation6 + $0x84] ss:$8 sps:$4 sm:$0xff]   ;;  %v934_v60 = vld [vmem:[#allocation6 + $0x80] ss:$8 sps:$4 sm:$0xff]  }
  0x30   :  { %266 = vmatprep.subr.bf16.mxu1 %v877_v20  ;;  %760 = vmatmul.mubr.msk.bf16.vlgmr.msra.gmra.mxu0 %vm131_vm0, %v66_v23  ;;  %v937_v61 = vld [vmem:[%s1202_s7 + $0x78] sm:$0xff]   ;;  %v939_v63 = vld [vmem:[%s1202_s7 + $0x70] sm:$0xff]   ;;  %v941_v1 = vld [vmem:[%s1202_s7 + $0x68] sm:$0xff]   ;;  %v300_v12 = vshrl.u32 %v299_v9, 7  ;;  %vm734_vm1 = vcmask 57344  }
  0x31   :  { %520 = vmatpush1.bf16.msra.mxu0 %v889_v24  ;;  %v938_v62 = vld [vmem:[%s1202_s7 + $0x38] sm:$0xff]   ;;  %v940_v0 = vld [vmem:[%s1202_s7 + $0x30] sm:$0xff]   ;;  %v942_v2 = vld [vmem:[%s1202_s7 + $0x28] sm:$0xff]  }
  0x32   :  { %521 = vmatprep.subr.bf16.mxu0 %v894_v26  ;;  %v943_v3 = vld [vmem:[%s1202_s7 + $0x60] sm:$0xff]   ;;  %v945_v5 = vld [vmem:[%s1202_s7 + $0x58] sm:$0xff]   ;;  %v947_v7 = vld [vmem:[%s1202_s7 + $0x50] sm:$0xff]   ;;  %v301_v15 = vsub.s32 0, %v300_v12  ;;  %v305_v17 = vsub.s32 1, %v300_v12 }
  0x33   :  { %267 = vmatpush1.bf16.msra.mxu1 %v879_v22  ;;  %v944_v4 = vld [vmem:[%s1202_s7 + $0x20] sm:$0xff]   ;;  %v946_v6 = vld [vmem:[%s1202_s7 + $0x18] sm:$0xff]   ;;  %v948_v8 = vld [vmem:[%s1202_s7 + $0x10] sm:$0xff]  }
  0x34   :  { %268 = vmatprep.subr.bf16.mxu1 %v883_v25  ;;  %v297_v16 = vld [vmem:[%s1199_s4] sm:$0x3]  ;;  %v949_v32 = vld [vmem:[%s1202_s7 + $0x48] sm:$0xff]  }
  0x35   :  { %522 = vmatpush1.bf16.msra.mxu0 %v892_v28  ;;  %v302_v18 = vrot.slane %v297_v16, %v301_v15  ;;  %v306_v21 = vrot.slane %v297_v16, %v305_v17 }
  0x36   :  { %523 = vmatprep.subr.bf16.mxu0 %v897_v30 }
  0x37   :  { %269 = vmatpush1.bf16.msra.mxu1 %v885_v27 }
  0x38   :  { %270 = vmatprep.subr.bf16.mxu1 %v886_v29 }
  0x39   :  { %524 = vmatpush1.bf16.msra.mxu0 %v895_v33  ;;  %v950_v33 = vld [vmem:[%s1202_s7 + $0x8] sm:$0xff]  }
  0x3a   :  { %525 = vmatprep.subr.bf16.mxu0 %v900_v34  ;;  %v951_v34 = vld [vmem:[%s1202_s7 + $0x40] sm:$0xff]  }
  0x3b   :  { %271 = vmatpush1.bf16.msra.mxu1 %v888_v31 }
  0x3c   :  { %825 = vmatprep.subr.bf16.mxu1 %v937_v61 }
  0x3d   :  { %526 = vmatpush1.bf16.msra.mxu0 %v898_v36  ;;  %v347_v36 = vld [vmem:[%s1201_s6] sm:$0x3]  ;;  %s1024_s6 = smov [#allocation8]  }
  0x3e   :  { %289 = vmatmul.mubr.bf16.vlgmr.msra.gmra.mxu1 %v64_v35  ;;  %527 = vmatprep.subr.bf16.mxu0 %v903_v37  ;;  %v952_v35 = vld [vmem:[%s1202_s7] sm:$0xff]   ;;  %v512_v37 = vrot.slane %v347_v36, %v301_v15  ;;  %s742_s18 = sshll.u32 %s1024_s6, 4  ;;  %s743_s18 = int_to_ptr.vmem [resolvable:$true] %s742_s18 }
  0x3f   :  { %826 = vmatpush3.bf16.msra.mxu1 %v938_v62  ;;  %s993_s19 = scalar_lea.vmem %s743_s18, 16  ;;  %s997_s20 = scalar_lea.vmem %s743_s18, 32 }
  0x40   :  { %827 = vmatprep.subr.bf16.mxu1 %v939_v63  ;;  %p994_p10 = scmp.ne.s32.totalorder %s743_s18, %s993_s19  ;;  %p998_p11 = scmp.lt.s32.totalorder %s743_s18, %s743_s18 }
  0x41   :  { %528 = vmatpush1.bf16.msra.mxu0 %v901_v38  ;;  %v516_v38 = vrot.slane %v347_v36, %v305_v17  ;;  %p999_p12 = scmp.lt.s32.totalorder %s997_s20, %s993_s19 }
  0x42   :  { %529 = vmatprep.subr.bf16.mxu0 %v906_v39 }
  0x43   :  { %828 = vmatpush3.bf16.msra.mxu1 %v940_v0  ;;  %p1000_p13 = por %p999_p12, %p998_p11 }
  0x44   :  { %829 = vmatprep.subr.bf16.mxu1 %v941_v1 }
  0x45   :  { %530 = vmatpush1.bf16.msra.mxu0 %v904_v40  ;;  %p1001_p0 = pnand %p1000_p13, %p994_p10 }
  0x46   :  { %531 = vmatprep.subr.bf16.mxu0 %v909_v41 }
  0x47   :  { %830 = vmatpush3.bf16.msra.mxu1 %v942_v2 }
  0x48   :  { %831 = vmatprep.subr.bf16.mxu1 %v943_v3 }
  0x49   :  { %532 = vmatpush1.bf16.msra.mxu0 %v907_v42 }
  0x4a   :  { %533 = vmatprep.subr.bf16.mxu0 %v912_v43 }
  0x4b   :  { %832 = vmatpush3.bf16.msra.mxu1 %v944_v4 }
  0x4c   :  { %833 = vmatprep.subr.bf16.mxu1 %v945_v5 }
  0x4d   :  { %534 = vmatpush1.bf16.msra.mxu0 %v910_v44 }
  0x4e   :  { %535 = vmatprep.subr.bf16.mxu0 %v915_v45 }
  0x4f   :  { %834 = vmatpush3.bf16.msra.mxu1 %v946_v6 }
  0x50   :  { %835 = vmatprep.subr.bf16.mxu1 %v947_v7 }
  0x51   :  { %536 = vmatpush2.bf16.msra.mxu0 %v913_v46 }
  0x52   :  { %537 = vmatprep.subr.bf16.mxu0 %v918_v47 }
  0x53   :  { %836 = vmatpush3.bf16.msra.mxu1 %v948_v8 }
  0x54   :  { %837 = vmatprep.subr.bf16.mxu1 %v949_v32 }
  0x55   :  { %538 = vmatpush2.bf16.msra.mxu0 %v916_v48 }
  0x56   :  { %539 = vmatprep.subr.bf16.mxu0 %v921_v49 }
  0x57   :  { %838 = vmatpush3.bf16.msra.mxu1 %v950_v33 }
  0x58   :  { %839 = vmatprep.subr.bf16.mxu1 %v951_v34 }
  0x59   :  { %540 = vmatpush2.bf16.msra.mxu0 %v919_v50  ;;  %v597_v50 = vstv %s1203_s8 }
  0x5a   :  { %541 = vmatprep.subr.bf16.mxu0 %v924_v51 }
  0x5b   :  { %840 = vmatpush3.bf16.msra.mxu1 %v952_v35 }
  0x5d   :  { %542 = vmatpush2.bf16.msra.mxu0 %v922_v52 }
  0x5e   :  { %543 = vmatprep.subr.bf16.mxu0 %v927_v54 }
  0x61   :  { %544 = vmatpush2.bf16.msra.mxu0 %v925_v53 }
  0x62   :  { %545 = vmatprep.subr.bf16.mxu0 %v930_v55 }
  0x65   :  { %546 = vmatpush2.bf16.msra.mxu0 %v928_v56 }
  0x66   :  { %547 = vmatprep.subr.bf16.mxu0 %v933_v57 }
  0x69   :  { %548 = vmatpush2.bf16.msra.mxu0 %v931_v58 }
  0x6a   :  { %549 = vmatprep.subr.bf16.mxu0 %v936_v59 }
  0x6d   :  { %550 = vmatpush2.bf16.msra.mxu0 %v934_v60 }
  0xf0   :  { %v169_v10 = vpop.f32.mrf.mxu0 }
  0xf2   :  { %v171_v11 = vpop.f32.mrf.mxu0 }
  0xf4   :  { %v173_v13 = vpop.f32.mrf.mxu0 }
  0xf6   :  { %v174_v14 = vpop.f32.mrf.mxu0 }
  0xfe   :  { %v290_v19 = vpop.f32.mrf.mxu1 }
  0xff   :  { %v291_v20 = vadd.f32 %v290_v19, %v169_v10 }
 0x100   :  { %v292_v22 = vpop.f32.mrf.mxu1 }
 0x101   :  { %v309_v23 = vadd.f32 %v302_v18, %v291_v20  ;;  %v293_v24 = vadd.f32 %v292_v22, %v171_v11 }
 0x102   :  { %v294_v25 = vpop.f32.mrf.mxu1 }
 0x103   :  { %v310_v26 = vadd.f32 %v306_v21, %v293_v24  ;;  %v311_v27 = vmax.f32 %v309_v23, 0.0 }
 0x104   :  { %v295_v28 = vpop.f32.mrf.mxu1 }
 0x105   :  { %v312_v29 = vmax.f32 %v310_v26, 0.0  ;;  %v313_v31 = vpack.c.bf16 %v311_v27, %v311_v27 }
 0x107   :  { %v314_v30 = vpack.c.bf16 %v312_v29, %v312_v29 }
 0x109   :  { %551 = vmatprep.mubr.bf16.mxu0 %v314_v30 }
 0x10a   :  { %552 = vmatmul.mubr.bf16.vlgmr.msra.gmra.mxu0 %v313_v31 }
 0x1ca   :  { %v553_v39 = vpop.f32.mrf.mxu0 }
 0x1cb   :  { %v554_v40 = vadd.f32 %v553_v39, %v512_v37 }
 0x1cc   :  { %v555_v41 = vpop.f32.mrf.mxu0 }
 0x1cd   :  { %v556_v42 = vadd.f32 %v555_v41, %v516_v38  ;;  %v560_v43 = vmax.f32 %v554_v40, 0.0 }
 0x1ce   :  { %v557_v44 = vpop.f32.mrf.mxu0 }
 0x1cf   :  { %v561_v45 = vmax.f32 %v556_v42, 0.0  ;;  %v562_v48 = vpack.c.bf16 %v560_v43, %v560_v43 }
 0x1d0   :  { %v558_v46 = vpop.f32.mrf.mxu0 }
 0x1d1   :  { %v563_v47 = vpack.c.bf16 %v561_v45, %v561_v45 }
 0x1d3   :  { %726 = vmatprep.mubr.bf16.mxu1 %v563_v47 }
 0x1d4   :  { %727 = vmatmul.mubr.bf16.vlgmr.msra.gmra.mxu1 %v562_v48 }
 0x294   :  { %v841_v49 = vpop.f32.mrf.mxu1 }
 0x296   :  { %v842_v51 = vpop.f32.mrf.mxu1 }
 0x297   :  { %v843_v52 = vadd.f32 %v842_v51, %v841_v49 }
 0x298   :  { %v844_v53 = vpop.f32.mrf.mxu1 }
 0x299   :  { %v729_v54 = vadd.f32 %v843_v52, %v597_v50 }
 0x29a   :  { %v845_v55 = vpop.f32.mrf.mxu1 }
 0x29b   :  { %735 = vst.msk [vmem:[#allocation8] sm:$0x1] %vm734_vm1, %v729_v54 }
 0x29c   :  { %1004 = shalt.err (!%p1001_p0)
}
 0x29d   :  { %745 = dma.vmem_to_hbm [thread:$0]  %s743_s18, 16, %s1204_s9, [#allocation5]  }
 0x29e   :  { %1017 = dma.done.wait [#allocation5], 16  }
 0x29f   :  { %1018 = vsyncadd [#allocation5], 4294967280 }
 0x2a0   :  { %749 = vsyncpa [#allocation4], 1 }
 0x2a1   :  { %750 = vsyncpa [#allocation7], 1 }
 0x2a2   :  { %751 = vsyncpa [#allocation5], 1 }

</bundles_post_ra>
